<compile_context>
chip_gen: v5e
topology: v5e:2x2
jax: 0.10.0
libtpu: 0.0.40
codegen_flags: <defaults>
</compile_context>

<pallas_src>
import jax
import jax.numpy as jnp
from jax.experimental import pallas as pl
from jax.experimental.pallas import tpu as pltpu

NUM_CLASSES = 8          # stand-in for cfg.MODEL.NUM_CLASSES
_LANE = 128
_SUBLANE = 8
_FOLDED_MXU_DTYPE = jnp.bfloat16   # contraction dtype for the pool-folded matmul


def _round_up(x, m):
    return (x + m - 1) // m * m


def _vmem_capacity_bytes():
    """Per-core VMEM capacity; conservative fallback if the query is unavailable."""
    try:
        info = pltpu.get_tpu_info()
        cap = getattr(info, "vmem_capacity_bytes", None)
        if cap:
            return int(cap)
    except Exception:
        pass
    return 64 * 1024 * 1024   # v7x per-TC size: safe lower bound everywhere


def _linear_bias_kernel(x_ref, w_ref, b_ref, o_ref):
    # x_ref: (TN, D)  w_ref: (D, Kp)  b_ref: (1, Kp)  o_ref: (TN, Kp)
    x = x_ref[...]
    w = w_ref[...]
    if x.dtype != w.dtype:
        # Cast the tile in VMEM so the MXU runs its native (bf16) contraction;
        # accumulation stays f32 via preferred_element_type.
        x = x.astype(w.dtype)
    out = jnp.dot(x, w, preferred_element_type=jnp.float32)
    o_ref[...] = (out + b_ref[...].astype(jnp.float32)).astype(o_ref.dtype)


def _linear_pallas(x2, w_p, b_p, k):
    """(x2 @ w_p + b_p)[:, :k].  w_p is (D, Kp) with Kp a multiple of 128."""
    n, d = x2.shape
    kp = w_p.shape[1]
    x_bytes = jnp.dtype(x2.dtype).itemsize
    w_bytes = jnp.dtype(w_p.dtype).itemsize

    # Generation-aware budgets.
    cap = _vmem_capacity_bytes()
    x_tile_bytes = (8 << 20) if cap < (100 << 20) else (16 << 20)   # v7x vs v5e/v6e

    # Row tile: as large as the per-buffer budget allows (fewer grid steps on a
    # mem-bound stream), rounded to the sublane granule.
    tn = x_tile_bytes // max(1, d * x_bytes)
    tn = max(_SUBLANE, (min(tn, 2048) // _SUBLANE) * _SUBLANE)
    tn = min(tn, _round_up(n, _SUBLANE))
    if n >= 2 * _SUBLANE:
        # Keep at least 2 grid steps so "parallel" can shard rows across both
        # TensorCores on v7x (no-op on single-TC chips).
        tn = min(tn, max(_SUBLANE, _round_up((n + 1) // 2, _SUBLANE)))

    # No padding of x: cdiv grid with a (masked) partial tail block.  Rows are
    # independent, so the unspecified tail rows never touch valid output.
    grid = (pl.cdiv(n, tn),)

    vmem_needed = (2 * tn * d * x_bytes      # x row tile, double-buffered
                   + d * kp * w_bytes        # weight, single-buffered (Buffered(1))
                   + 2 * tn * kp * 4         # f32 output tile, double-buffered
                   + kp * 4)                 # bias, single-buffered
    vmem_limit = min(int(0.75 * cap), max(32 << 20, int(1.25 * vmem_needed)))
    vmem_limit = max(vmem_limit, int(vmem_needed) + (2 << 20))

    out = pl.pallas_call(
        _linear_bias_kernel,
        out_shape=jax.ShapeDtypeStruct((n, kp), jnp.float32),
        grid_spec=pltpu.PrefetchScalarGridSpec(
            num_scalar_prefetch=0,
            grid=grid,
            in_specs=[
                pl.BlockSpec((tn, d), lambda i: (i, 0)),            # x row tile
                pl.BlockSpec((d, kp), lambda i: (0, 0),
                             pipeline_mode=pl.Buffered(1)),          # resident weight
                pl.BlockSpec((1, kp), lambda i: (0, 0),
                             pipeline_mode=pl.Buffered(1)),          # resident bias
            ],
            out_specs=pl.BlockSpec((tn, kp), lambda i: (i, 0)),
        ),
        compiler_params=pltpu.CompilerParams(
            dimension_semantics=("parallel",),
            vmem_limit_bytes=int(vmem_limit),
        ),
        cost_estimate=pl.CostEstimate(
            flops=int(2 * n * d * kp),
            transcendentals=0,
            bytes_accessed=int(n * d * x_bytes + d * kp * w_bytes + n * kp * 4),
        ),
    )(x2, w_p, b_p)
    return out[:, :k]


@jax.jit
def cls_output_forward(x, weight, bias):
    """weight: (NUM_CLASSES, dim_in) as in nn.Linear; bias: (NUM_CLASSES,)."""
    k = weight.shape[0]
    kp = _round_up(k, _LANE)
    # Pad K -> Kp on the tiny (dim_in, K) transposed weight (lane-dense stores).
    w_t = jnp.zeros((weight.shape[1], kp), dtype=jnp.float32).at[:, :k].set(
        weight.T.astype(jnp.float32))
    b_p = jnp.zeros((1, kp), dtype=jnp.float32).at[0, :k].set(
        bias.astype(jnp.float32))

    if x.ndim == 4:
        n, c, h, w = x.shape
        hw = h * w
        # adaptive_avg_pool2d folded into the linear layer:
        #   mean_hw(x) @ W^T == x.reshape(N, C*HW) @ repeat(W^T / HW, HW, axis=0)
        # Pad -> scale -> cast happen on the small (C, Kp) array; only then is
        # the big folded weight materialized (directly in the MXU dtype).
        # TODO(synk): hoist this folded-weight build out of the per-call path
        # when weights are static (it only depends on weight and the RoI size).
        w_fold = (w_t * (1.0 / float(hw))).astype(_FOLDED_MXU_DTYPE)
        w_p = jnp.repeat(w_fold, hw, axis=0)                     # (C*HW, Kp)
        x2 = x.reshape(n, c * hw)   # free reshape; x stays in its HBM dtype
    else:
        x2 = x
        w_p = w_t.astype(x.dtype)
    return _linear_pallas(x2, w_p, b_p, k)


if __name__ == "__main__":
    key = jax.random.PRNGKey(0)
    k_x, k_w, k_x2, k_x3 = jax.random.split(key, 4)

    # Small shapes consistent with the module: NCHW feature map, dim_in = C.
    N, C, H, W = 2, 4, 16, 16
    x = jax.random.normal(k_x, (N, C, H, W), dtype=jnp.float32)

    # Deterministic init matching _init_weights: weight ~ N(0, 0.01), bias = 0.
    weight = 0.01 * jax.random.normal(k_w, (NUM_CLASSES, C), dtype=jnp.float32)
    bias = jnp.zeros((NUM_CLASSES,), dtype=jnp.float32)

    # 4-D path (pool folded into matmul; bf16 contraction, f32 accumulation).
    out = cls_output_forward(x, weight, bias)
    jax.block_until_ready(out)
    pooled_ref = jnp.mean(x, axis=(2, 3))
    ref = pooled_ref @ weight.T + bias
    assert out.shape == (N, NUM_CLASSES)
    # Looser tolerance than the pure-f32 version: the folded contraction rounds
    # x and W' to bf16 before the f32-accumulated MXU matmul.
    assert jnp.allclose(out, ref, atol=1e-4, rtol=2e-2), float(jnp.max(jnp.abs(out - ref)))

    # 4-D path with a row count that exercises the cdiv grid + partial tail block.
    N2 = 20
    x_big = jax.random.normal(k_x3, (N2, C, H, W), dtype=jnp.float32)
    out_big = cls_output_forward(x_big, weight, bias)
    jax.block_until_ready(out_big)
    ref_big = jnp.mean(x_big, axis=(2, 3)) @ weight.T + bias
    assert out_big.shape == (N2, NUM_CLASSES)
    assert jnp.allclose(out_big, ref_big, atol=1e-4, rtol=2e-2)

    # 2-D path (already-pooled features, stays in the input dtype / f32).
    x2d = jax.random.normal(k_x2, (N, C), dtype=jnp.float32)
    out2 = cls_output_forward(x2d, weight, bias)
    jax.block_until_ready(out2)
    ref2 = x2d @ weight.T + bias
    assert out2.shape == (N, NUM_CLASSES)
    assert jnp.allclose(out2, ref2, atol=1e-5, rtol=1e-5)

    print("KERNEL_OK")
</pallas_src>

<mosaic_0001>
module attributes {stable_mosaic.version = 11 : i64} {
  func.func @_linear_bias_kernel(%arg0: i32, %arg1: memref<8x1024xf32, #tpu.memory_space<vmem>>, %arg2: memref<1024x128xbf16, #tpu.memory_space<vmem>>, %arg3: memref<1x128xf32, #tpu.memory_space<vmem>>, %arg4: memref<8x128xf32, #tpu.memory_space<vmem>>) attributes {dimension_semantics = [#tpu.dimension_semantics<parallel>], iteration_bounds = array<i64: 1>, scalar_prefetch = 0 : i64, scratch_operands = 0 : i64, tpu.core_type = #tpu.core_type<tc>, window_params = [{transform_indices = @transform_0, window_bounds = array<i64: 8, 1024>}, {pipeline_mode = #tpu.pipeline_mode<synchronous>, transform_indices = @transform_1, window_bounds = array<i64: 1024, 128>}, {pipeline_mode = #tpu.pipeline_mode<synchronous>, transform_indices = @transform_2, window_bounds = array<i64: 1, 128>}, {transform_indices = @transform_3, window_bounds = array<i64: 8, 128>}]} {
    %c0 = arith.constant 0 : index
    %c0_0 = arith.constant 0 : index
    %0 = vector.load %arg1[%c0, %c0_0] : memref<8x1024xf32, #tpu.memory_space<vmem>>, vector<8x1024xf32>
    %c0_1 = arith.constant 0 : index
    %c0_2 = arith.constant 0 : index
    %1 = vector.load %arg2[%c0_1, %c0_2] : memref<1024x128xbf16, #tpu.memory_space<vmem>>, vector<1024x128xbf16>
    %2 = arith.truncf %0 : vector<8x1024xf32> to vector<8x1024xbf16>
    %cst = arith.constant dense<0.000000e+00> : vector<8x128xf32>
    %3 = tpu.matmul %2, %1, %cst {dimension_numbers = #tpu.dot_dimension_numbers<[1], [0], [0], [1], [0, 0, 1, 1], [], []>} : vector<8x1024xbf16>, vector<1024x128xbf16>, vector<8x128xf32> -> vector<8x128xf32>
    %c0_3 = arith.constant 0 : index
    %c0_4 = arith.constant 0 : index
    %4 = vector.load %arg3[%c0_3, %c0_4] : memref<1x128xf32, #tpu.memory_space<vmem>>, vector<1x128xf32>
    %5 = vector.broadcast %4 : vector<1x128xf32> to vector<8x128xf32>
    %6 = arith.addf %3, %5 : vector<8x128xf32>
    %c0_5 = arith.constant 0 : index
    %c0_6 = arith.constant 0 : index
    %7 = vector.load %arg4[%c0_5, %c0_6] : memref<8x128xf32, #tpu.memory_space<vmem>>, vector<8x128xf32>
    tpu.vector_store %arg4[%c0_5, %c0_6], %6 {strides = array<i32>} : memref<8x128xf32, #tpu.memory_space<vmem>>, vector<8x128xf32>,
    return
  }
  func.func @transform_0(%arg0: i32) -> (i32, i32) {
    %c0_i32 = arith.constant 0 : i32
    %c0_i32_0 = arith.constant 0 : i32
    return %arg0, %c0_i32 : i32, i32
  }
  func.func @transform_1(%arg0: i32) -> (i32, i32) {
    %c0_i32 = arith.constant 0 : i32
    %c0_i32_0 = arith.constant 0 : i32
    %c0_i32_1 = arith.constant 0 : i32
    return %c0_i32, %c0_i32_0 : i32, i32
  }
  func.func @transform_2(%arg0: i32) -> (i32, i32) {
    %c0_i32 = arith.constant 0 : i32
    %c0_i32_0 = arith.constant 0 : i32
    %c0_i32_1 = arith.constant 0 : i32
    return %c0_i32, %c0_i32_0 : i32, i32
  }
  func.func @transform_3(%arg0: i32) -> (i32, i32) {
    %c0_i32 = arith.constant 0 : i32
    %c0_i32_0 = arith.constant 0 : i32
    return %arg0, %c0_i32 : i32, i32
  }
}

</mosaic_0001>

<bundles_post_ra>
// kernel: cls_output_forward.1
= control target key start
LH: loop header
LB: loop body
LE: loop exit
PB: predicated region body
PF: predicated region fallthrough
CT: control target
= control target key end

     0   :  { %8 = vsyncpa [#allocation3], 0  ;;  %s1304_s0 = inlined_call_operand.vmem [shape: f32[2,1024], index: 0, kind: input, shape index: {}]   ;;  %s1305_s1 = inlined_call_operand.vmem [shape: bf16[1024,128], index: 1, kind: input, shape index: {}]   ;;  %s1306_s2 = inlined_call_operand.vmem [shape: f32[1,128], index: 2, kind: input, shape index: {}]   ;;  %s1307_s3 = inlined_call_operand.hbm [shape: f32[2,128], index: 3, kind: output, shape index: {}]  }
   0x1   :  { %v972_v0 = vld [vmem:[%s1305_s1 + $0x38] sm:$0xff]  ;;  %v971_v4 = vld [vmem:[%s1305_s1 + $0x30] sm:$0xff]  ;;  %v970_v8 = vld [vmem:[%s1305_s1 + $0x28] sm:$0xff] }
   0x2   :  { %v980_v1 = vld [vmem:[%s1305_s1 + $0x78] sm:$0xff]  ;;  %586 = vmatpush.bf16.msra.mxu0 %v972_v0  ;;  %v979_v5 = vld [vmem:[%s1305_s1 + $0x70] sm:$0xff]  ;;  %v978_v9 = vld [vmem:[%s1305_s1 + $0x68] sm:$0xff] }
   0x3   :  { %v988_v2 = vld [vmem:[%s1305_s1 + $0xb8] sm:$0xff]  ;;  %599 = vmatpush.bf16.msra.mxu1 %v980_v1  ;;  %v987_v6 = vld [vmem:[%s1305_s1 + $0xb0] sm:$0xff]  ;;  %v986_v10 = vld [vmem:[%s1305_s1 + $0xa8] sm:$0xff] }
   0x4   :  { %v996_v3 = vld [vmem:[%s1305_s1 + $0xf8] sm:$0xff]  ;;  %612 = vmatpush.bf16.msra.mxu2 %v988_v2  ;;  %v995_v7 = vld [vmem:[%s1305_s1 + $0xf0] sm:$0xff]  ;;  %v994_v11 = vld [vmem:[%s1305_s1 + $0xe8] sm:$0xff] }
   0x5   :  { %625 = vmatpush.bf16.msra.mxu3 %v996_v3  ;;  %v969_v12 = vld [vmem:[%s1305_s1 + $0x20] sm:$0xff]  ;;  %v968_v16 = vld [vmem:[%s1305_s1 + $0x18] sm:$0xff]  ;;  %v17_v19 = vld [vmem:[%s1304_s0 + $0x10] sm:$0xff] }
   0x6   :  { %587 = vmatpush.bf16.msra.mxu0 %v971_v4  ;;  %v977_v13 = vld [vmem:[%s1305_s1 + $0x60] sm:$0xff]  ;;  %v976_v17 = vld [vmem:[%s1305_s1 + $0x58] sm:$0xff]  ;;  %v21_v21 = vld [vmem:[%s1304_s0 + $0x30] sm:$0xff]  ;;  %161 = vst [vmem:[#allocation1 + $0x1] ss:$4 sm:$0xff] %v17_v19 }
   0x7   :  { %600 = vmatpush.bf16.msra.mxu1 %v979_v5  ;;  %v985_v14 = vld [vmem:[%s1305_s1 + $0xa0] sm:$0xff]  ;;  %v984_v22 = vld [vmem:[%s1305_s1 + $0x98] sm:$0xff]  ;;  %165 = vst [vmem:[#allocation1 + $0x3] ss:$4 sm:$0xff] %v21_v21  ;;  %v967_v24 = vld [vmem:[%s1305_s1 + $0x10] sm:$0xff] }
   0x8   :  { %613 = vmatpush.bf16.msra.mxu2 %v987_v6  ;;  %v993_v15 = vld [vmem:[%s1305_s1 + $0xe0] sm:$0xff]  ;;  %v992_v23 = vld [vmem:[%s1305_s1 + $0xd8] sm:$0xff]  ;;  %v975_v25 = vld [vmem:[%s1305_s1 + $0x50] sm:$0xff] }
   0x9   :  { %626 = vmatpush.bf16.msra.mxu3 %v995_v7  ;;  %v15_v18 = vld [vmem:[%s1304_s0] sm:$0xff]  ;;  %v983_v26 = vld [vmem:[%s1305_s1 + $0x90] sm:$0xff]  ;;  %v16_v28 = vld [vmem:[%s1304_s0 + $0x8] sm:$0xff] }
   0xa   :  { %588 = vmatpush.bf16.msra.mxu0 %v970_v8  ;;  %v19_v20 = vld [vmem:[%s1304_s0 + $0x20] sm:$0xff]  ;;  %159 = vst [vmem:[#allocation1] ss:$4 sm:$0xff] %v15_v18  ;;  %v991_v27 = vld [vmem:[%s1305_s1 + $0xd0] sm:$0xff]  ;;  %v18_v29 = vld [vmem:[%s1304_s0 + $0x18] sm:$0xff] }
   0xb   :  { %601 = vmatpush.bf16.msra.mxu1 %v978_v9  ;;  %163 = vst [vmem:[#allocation1 + $0x2] ss:$4 sm:$0xff] %v19_v20  ;;  %v966_v30 = vld [vmem:[%s1305_s1 + $0x8] sm:$0xff]  ;;  %v965_v35 = vld [vmem:[%s1305_s1] sm:$0xff]  ;;  %v22_v36 = vld [vmem:[%s1304_s0 + $0x38] sm:$0xff] }
   0xc   :  { %614 = vmatpush.bf16.msra.mxu2 %v986_v10  ;;  %v974_v31 = vld [vmem:[%s1305_s1 + $0x48] sm:$0xff]  ;;  %167 = vst [vmem:[#allocation1 + $0x20] ss:$4 sm:$0xff] %v16_v28  ;;  %v973_v37 = vld [vmem:[%s1305_s1 + $0x40] sm:$0xff]  ;;  %v1004_v40 = vld [vmem:[%s1305_s1 + $0x138] sm:$0xff] }
   0xd   :  { %627 = vmatpush.bf16.msra.mxu3 %v994_v11  ;;  %v982_v32 = vld [vmem:[%s1305_s1 + $0x88] sm:$0xff]  ;;  %169 = vst [vmem:[#allocation1 + $0x21] ss:$4 sm:$0xff] %v18_v29  ;;  %v981_v38 = vld [vmem:[%s1305_s1 + $0x80] sm:$0xff]  ;;  %v1012_v42 = vld [vmem:[%s1305_s1 + $0x178] sm:$0xff] }
   0xe   :  { %589 = vmatpush.bf16.msra.mxu0 %v969_v12  ;;  %v990_v33 = vld [vmem:[%s1305_s1 + $0xc8] sm:$0xff]  ;;  %v989_v39 = vld [vmem:[%s1305_s1 + $0xc0] sm:$0xff]  ;;  %173 = vst [vmem:[#allocation1 + $0x23] ss:$4 sm:$0xff] %v22_v36  ;;  %v1020_v46 = vld [vmem:[%s1305_s1 + $0x1b8] sm:$0xff] }
   0xf   :  { %602 = vmatpush.bf16.msra.mxu1 %v977_v13  ;;  %v20_v34 = vld [vmem:[%s1304_s0 + $0x28] sm:$0xff]  ;;  %v1028_v47 = vld [vmem:[%s1305_s1 + $0x1f8] sm:$0xff]  ;;  %v1003_v52 = vld [vmem:[%s1305_s1 + $0x130] sm:$0xff] }
  0x10   :  { %615 = vmatpush.bf16.msra.mxu2 %v985_v14  ;;  %171 = vst [vmem:[#allocation1 + $0x22] ss:$4 sm:$0xff] %v20_v34  ;;  %v1011_v53 = vld [vmem:[%s1305_s1 + $0x170] sm:$0xff]  ;;  %v1002_v56 = vld [vmem:[%s1305_s1 + $0x128] sm:$0xff]  ;;  %v1001_v60 = vld [vmem:[%s1305_s1 + $0x120] sm:$0xff] }
  0x11   :  { %628 = vmatpush.bf16.msra.mxu3 %v993_v15  ;;  %v1019_v54 = vld [vmem:[%s1305_s1 + $0x1b0] sm:$0xff]  ;;  %v1010_v57 = vld [vmem:[%s1305_s1 + $0x168] sm:$0xff]  ;;  %v1009_v61 = vld [vmem:[%s1305_s1 + $0x160] sm:$0xff] }
  0x12   :  { %590 = vmatpush.bf16.msra.mxu0 %v968_v16  ;;  %v176_v41 = vld.sshfl [vmem:[#allocation1 + $0x10] sm:$0xff pattern:$0x73625140]  ;;  %v177_v43 = vld.sshfl [vmem:[#allocation1 + $0x18] sm:$0xff pattern:$0x73625140] }
  0x13   :  { %603 = vmatpush.bf16.msra.mxu1 %v976_v17  ;;  %v174_v44 = vld.sshfl [vmem:[#allocation1] sm:$0xff pattern:$0x73625140]  ;;  %v175_v45 = vld.sshfl [vmem:[#allocation1 + $0x8] sm:$0xff pattern:$0x73625140]  ;;  %v192_v48 = vpack.c.bf16 %v176_v41, %v176_v41  ;;  %v193_v49 = vpack.c.bf16 %v177_v43, %v177_v43 }
  0x14   :  { %616 = vmatpush.bf16.msra.mxu2 %v984_v22  ;;  %v190_v50 = vpack.c.bf16 %v174_v44, %v174_v44  ;;  %v191_v51 = vpack.c.bf16 %v175_v45, %v175_v45  ;;  %v1027_v55 = vld [vmem:[%s1305_s1 + $0x1f0] sm:$0xff]  ;;  %v1018_v58 = vld [vmem:[%s1305_s1 + $0x1a8] sm:$0xff]  ;;  %v1017_v62 = vld [vmem:[%s1305_s1 + $0x1a0] sm:$0xff] }
  0x15   :  { %629 = vmatpush.bf16.msra.mxu3 %v992_v23  ;;  %v1026_v59 = vld [vmem:[%s1305_s1 + $0x1e8] sm:$0xff]  ;;  %v1025_v63 = vld [vmem:[%s1305_s1 + $0x1e0] sm:$0xff]  ;;  %v1000_v0 = vld [vmem:[%s1305_s1 + $0x118] sm:$0xff] }
  0x16   :  { %591 = vmatpush.bf16.msra.mxu0 %v967_v24  ;;  %v1008_v1 = vld [vmem:[%s1305_s1 + $0x158] sm:$0xff]  ;;  %v999_v4 = vld [vmem:[%s1305_s1 + $0x110] sm:$0xff]  ;;  %v998_v8 = vld [vmem:[%s1305_s1 + $0x108] sm:$0xff] }
  0x17   :  { %604 = vmatpush.bf16.msra.mxu1 %v975_v25  ;;  %v1016_v2 = vld [vmem:[%s1305_s1 + $0x198] sm:$0xff]  ;;  %v1007_v5 = vld [vmem:[%s1305_s1 + $0x150] sm:$0xff]  ;;  %v1006_v9 = vld [vmem:[%s1305_s1 + $0x148] sm:$0xff] }
  0x18   :  { %617 = vmatpush.bf16.msra.mxu2 %v983_v26  ;;  %v1024_v3 = vld [vmem:[%s1305_s1 + $0x1d8] sm:$0xff]  ;;  %v1015_v6 = vld [vmem:[%s1305_s1 + $0x190] sm:$0xff]  ;;  %v1014_v10 = vld [vmem:[%s1305_s1 + $0x188] sm:$0xff] }
  0x19   :  { %630 = vmatpush.bf16.msra.mxu3 %v991_v27  ;;  %v1023_v7 = vld [vmem:[%s1305_s1 + $0x1d0] sm:$0xff]  ;;  %v1022_v11 = vld [vmem:[%s1305_s1 + $0x1c8] sm:$0xff]  ;;  %v997_v12 = vld [vmem:[%s1305_s1 + $0x100] sm:$0xff] }
  0x1a   :  { %592 = vmatpush.bf16.msra.mxu0 %v966_v30  ;;  %v1005_v13 = vld [vmem:[%s1305_s1 + $0x140] sm:$0xff]  ;;  %v179_v17 = vld.sshfl [vmem:[#allocation1 + $0x28] sm:$0xff pattern:$0x73625140] }
  0x1b   :  { %605 = vmatpush.bf16.msra.mxu1 %v974_v31  ;;  %v1013_v14 = vld [vmem:[%s1305_s1 + $0x180] sm:$0xff]  ;;  %v180_v18 = vld.sshfl [vmem:[#allocation1 + $0x30] sm:$0xff pattern:$0x73625140]  ;;  %v195_v21 = vpack.c.bf16 %v179_v17, %v179_v17 }
  0x1c   :  { %618 = vmatpush.bf16.msra.mxu2 %v982_v32  ;;  %v1021_v15 = vld [vmem:[%s1305_s1 + $0x1c0] sm:$0xff]  ;;  %v181_v19 = vld.sshfl [vmem:[#allocation1 + $0x38] sm:$0xff pattern:$0x73625140]  ;;  %v196_v22 = vpack.c.bf16 %v180_v18, %v180_v18 }
  0x1d   :  { %631 = vmatpush.bf16.msra.mxu3 %v990_v33  ;;  %v178_v16 = vld.sshfl [vmem:[#allocation1 + $0x20] sm:$0xff pattern:$0x73625140]  ;;  %v197_v23 = vpack.c.bf16 %v181_v19, %v181_v19 }
  0x1e   :  { %593 = vmatpush.bf16.msra.mxu0 %v965_v35  ;;  %v194_v20 = vpack.c.bf16 %v178_v16, %v178_v16  ;;  %v1032_v30 = vld [vmem:[%s1306_s2] ss:$0 sm:$0xff] }
  0x1f   :  { %606 = vmatpush.bf16.msra.mxu1 %v973_v37 }
  0x20   :  { %619 = vmatpush.bf16.msra.mxu2 %v981_v38 }
  0x21   :  { %632 = vmatpush.bf16.msra.mxu3 %v989_v39  ;;  %594 = vmatmul.bf16.vlgmr.msra.gmra.mxu0 %v190_v50 }
  0x22   :  { %638 = vmatpush.bf16.msrb.mxu0 %v1004_v40  ;;  %607 = vmatmul.bf16.vlgmr.msra.gmra.mxu1 %v191_v51 }
  0x23   :  { %651 = vmatpush.bf16.msrb.mxu1 %v1012_v42  ;;  %620 = vmatmul.bf16.vlgmr.msra.gmra.mxu2 %v192_v48 }
  0x24   :  { %664 = vmatpush.bf16.msrb.mxu2 %v1020_v46  ;;  %633 = vmatmul.bf16.vlgmr.msra.gmra.mxu3 %v193_v49 }
  0x25   :  { %677 = vmatpush.bf16.msrb.mxu3 %v1028_v47 }
  0x26   :  { %639 = vmatpush.bf16.msrb.mxu0 %v1003_v52 }
  0x27   :  { %652 = vmatpush.bf16.msrb.mxu1 %v1011_v53 }
  0x28   :  { %665 = vmatpush.bf16.msrb.mxu2 %v1019_v54 }
  0x29   :  { %678 = vmatpush.bf16.msrb.mxu3 %v1027_v55 }
  0x2a   :  { %640 = vmatpush.bf16.msrb.mxu0 %v1002_v56 }
  0x2b   :  { %653 = vmatpush.bf16.msrb.mxu1 %v1010_v57 }
  0x2c   :  { %666 = vmatpush.bf16.msrb.mxu2 %v1018_v58 }
  0x2d   :  { %679 = vmatpush.bf16.msrb.mxu3 %v1026_v59 }
  0x2e   :  { %641 = vmatpush.bf16.msrb.mxu0 %v1001_v60 }
  0x2f   :  { %654 = vmatpush.bf16.msrb.mxu1 %v1009_v61 }
  0x30   :  { %667 = vmatpush.bf16.msrb.mxu2 %v1017_v62 }
  0x31   :  { %680 = vmatpush.bf16.msrb.mxu3 %v1025_v63 }
  0x32   :  { %642 = vmatpush.bf16.msrb.mxu0 %v1000_v0 }
  0x33   :  { %655 = vmatpush.bf16.msrb.mxu1 %v1008_v1 }
  0x34   :  { %668 = vmatpush.bf16.msrb.mxu2 %v1016_v2 }
  0x35   :  { %681 = vmatpush.bf16.msrb.mxu3 %v1024_v3 }
  0x36   :  { %643 = vmatpush.bf16.msrb.mxu0 %v999_v4 }
  0x37   :  { %656 = vmatpush.bf16.msrb.mxu1 %v1007_v5 }
  0x38   :  { %669 = vmatpush.bf16.msrb.mxu2 %v1015_v6 }
  0x39   :  { %682 = vmatpush.bf16.msrb.mxu3 %v1023_v7 }
  0x3a   :  { %644 = vmatpush.bf16.msrb.mxu0 %v998_v8 }
  0x3b   :  { %657 = vmatpush.bf16.msrb.mxu1 %v1006_v9 }
  0x3c   :  { %670 = vmatpush.bf16.msrb.mxu2 %v1014_v10 }
  0x3d   :  { %683 = vmatpush.bf16.msrb.mxu3 %v1022_v11 }
  0x3e   :  { %645 = vmatpush.bf16.msrb.mxu0 %v997_v12 }
  0x3f   :  { %658 = vmatpush.bf16.msrb.mxu1 %v1005_v13 }
  0x40   :  { %671 = vmatpush.bf16.msrb.mxu2 %v1013_v14 }
  0x41   :  { %684 = vmatpush.bf16.msrb.mxu3 %v1021_v15  ;;  %646 = vmatmul.bf16.vlgmr.msrb.gmra.mxu0 %v194_v20 }
  0x42   :  { %659 = vmatmul.bf16.vlgmr.msrb.gmra.mxu1 %v195_v21 }
  0x43   :  { %672 = vmatmul.bf16.vlgmr.msrb.gmra.mxu2 %v196_v22 }
  0x44   :  { %685 = vmatmul.bf16.vlgmr.msrb.gmra.mxu3 %v197_v23 }
  0x9e   :  { %v595_v24 = vpop.f32.mrf.mxu0 }
  0x9f   :  { %v608_v25 = vpop.f32.mrf.mxu1  ;;  %v596_v33 = vadd.f32 %v1032_v30, %v595_v24 }
  0xa1   :  { %v609_v34 = vadd.f32 %v608_v25, %v596_v33 }
  0xa6   :  { %v621_v26 = vpop.f32.mrf.mxu2  ;;  %v597_v28 = vpop.f32.mrf.mxu0 }
  0xa7   :  { %v634_v27 = vpop.f32.mrf.mxu3  ;;  %v610_v29 = vpop.f32.mrf.mxu1  ;;  %v622_v35 = vadd.f32 %v621_v26, %v609_v34 }
  0xa9   :  { %v635_v36 = vadd.f32 %v634_v27, %v622_v35 }
  0xae   :  { %v623_v31 = vpop.f32.mrf.mxu2 }
  0xaf   :  { %v636_v32 = vpop.f32.mrf.mxu3 }
  0xbe   :  { %v647_v37 = vpop.f32.mrf.mxu0 }
  0xbf   :  { %v660_v38 = vpop.f32.mrf.mxu1  ;;  %v648_v39 = vadd.f32 %v647_v37, %v635_v36 }
  0xc1   :  { %v661_v40 = vadd.f32 %v660_v38, %v648_v39 }
  0xc6   :  { %v673_v41 = vpop.f32.mrf.mxu2  ;;  %v649_v44 = vpop.f32.mrf.mxu0 }
  0xc7   :  { %v686_v42 = vpop.f32.mrf.mxu3  ;;  %v674_v43 = vadd.f32 %v673_v41, %v661_v40  ;;  %v662_v45 = vpop.f32.mrf.mxu1 }
  0xc9   :  { %v687_v46 = vadd.f32 %v686_v42, %v674_v43 }
  0xcb   :  { %690 = vst [vmem:[#allocation2] sm:$0xff] %v687_v46 }
  0xce   :  { %v675_v47 = vpop.f32.mrf.mxu2 }
  0xcf   :  { %v688_v48 = vpop.f32.mrf.mxu3 }
  0xd0   :  { %694 = vsyncadd [#allocation3], 96  ;;  %s697_s20 = sshll.u32 %s1307_s3, 4  ;;  %s1059_s21 = smov [#allocation2]   ;;  %s698_s20 = int_to_ptr.hbm [resolvable:$true] %s697_s20 }
  0xd1   :  { %s695_s22 = sshll.u32 %s1059_s21, 4  ;;  %s1060_s23 = smov 32   ;;  %s696_s22 = int_to_ptr.vmem [resolvable:$true] %s695_s22 }
  0xd2   :  { %s1061_s24 = smov 2  }
  0xd3   :  { %703 = dma.vmem_to_hbm [thread:$0]  %s696_s22, 32, %s698_s20, [#allocation3], %s1060_s23, %s1060_s23, %s1061_s24  }
  0xd4   :  { %1057 = dma.done.wait [#allocation3], 128  }
  0xd5   :  { %1058 = vsyncadd [#allocation3], 4294967168 }
  0xd6   :  { %708 = vsyncpa [#allocation3], 1 }

</bundles_post_ra>
